<compile_context>
chip_gen: v7x
topology: tpu7x:2x2x1
jax: 0.10.0
libtpu: 0.0.40
codegen_flags: <defaults>
</compile_context>

<pallas_src>
import functools

import jax
import jax.numpy as jnp
from jax.experimental import pallas as pl
from jax.experimental.pallas import tpu as pltpu


def _tpu_vmem_capacity_bytes():
    """Per-TensorCore VMEM capacity, with a conservative (v7x) fallback."""
    try:
        return int(pltpu.get_tpu_info().vmem_capacity_bytes)
    except Exception:
        return 64 * 1024 * 1024


def _tpu_num_tensorcores():
    """Number of TensorCores behind one device (megacore) — perf knob only."""
    try:
        kind = jax.devices()[0].device_kind.lower()
    except Exception:
        return 1
    # Single-TC chips first (substring "v5" would otherwise match "v5 lite").
    if any(s in kind for s in ("v5 lite", "v5e", "v5litepod", "v6")):
        return 1
    if any(s in kind for s in ("v4", "v5p", "v5", "v7")):
        return 2
    return 1


def _focal_ce_kernel(x_ref, t_ref, o_ref, acc_ref, *, tile_n, tiles_per_shard, n_true):
    """Accumulates per-row CE into acc_ref; reduces to o_ref (1,1,1) at shard end."""
    i = pl.program_id(1)

    @pl.when(i == 0)
    def _():
        acc_ref[...] = jnp.zeros_like(acc_ref)
        o_ref[...] = jnp.zeros_like(o_ref)

    x = x_ref[...].astype(jnp.float32)          # (tile_n, C) upcast after DMA
    t = t_ref[...]                              # (tile_n, 1) int32 targets

    # Numerically stable per-row logsumexp. Block last dim == full C, so there
    # are no padded class lanes visible to the kernel (no class mask needed).
    m = jnp.max(x, axis=-1, keepdims=True)
    lse = jnp.log(jnp.sum(jnp.exp(x - m), axis=-1, keepdims=True)) + m

    # Gather the target-class logit via a one-hot mask (no dynamic gather on TPU).
    col = jax.lax.broadcasted_iota(jnp.int32, x.shape, 1)
    tgt_logit = jnp.sum(jnp.where(col == t, x, 0.0), axis=-1, keepdims=True)

    # Mask rows past the true N (ceil-div overhang / duplicated clamped tiles).
    # Garbage (even NaN/inf) in those rows is discarded by the select.
    tile_start = (pl.program_id(0) * tiles_per_shard + i) * tile_n
    row = tile_start + jax.lax.broadcasted_iota(jnp.int32, (tile_n, 1), 0)
    ce = jnp.where(row < n_true, lse - tgt_logit, 0.0)

    # Per-row vector accumulation (VPU add); no per-step XLU reduce or scalar RMW.
    acc_ref[...] += ce

    @pl.when(i == tiles_per_shard - 1)
    def _():
        o_ref[...] += jnp.sum(acc_ref[...])


def focal_loss(logits, target, gamma=0.0, alpha=1.0, *, tile_rows=2048, num_shards=None):
    """logits: (N, C) float, target: (N,) int -> scalar float32 focal loss."""
    n, c = logits.shape
    dtype = logits.dtype
    itemsize = jnp.dtype(dtype).itemsize

    # --- generation-aware VMEM budgeting -----------------------------------
    vmem_cap = _tpu_vmem_capacity_bytes()
    # Live bytes per logits element per pipeline stage: double-buffered input
    # in native dtype + f32 upcast + f32 exp temp + int32 iota / select temps.
    bytes_per_elem = 2 * itemsize + 16
    budget = int(vmem_cap * 0.45)
    max_rows = max(8, budget // (c * bytes_per_elem + 64))
    tile_n = min(int(tile_rows), int(max_rows), ((n + 7) // 8) * 8)
    tile_n = max(8, (tile_n // 8) * 8)
    vmem_limit = int(vmem_cap * 0.75)           # headroom for compiler scratch

    # --- grid: shard rows across TensorCores, tiles within a shard ----------
    total_tiles = -(-n // tile_n)               # ceil div
    if num_shards is None:
        num_shards = _tpu_num_tensorcores()
    num_shards = max(1, min(int(num_shards), total_tiles))
    tiles_per_shard = -(-total_tiles // num_shards)
    last_block = total_tiles - 1

    # Clamp the block index so tiles past the last real block re-read it (their
    # rows are masked in-kernel); every DMA is then in-bounds / overhang-only.
    def row_block(s, i):
        return (jnp.minimum(s * tiles_per_shard + i, last_block), 0)

    t = target.reshape(n, 1).astype(jnp.int32)

    kernel = functools.partial(_focal_ce_kernel, tile_n=tile_n,
                               tiles_per_shard=tiles_per_shard, n_true=n)

    partial_ce = pl.pallas_call(
        kernel,
        out_shape=jax.ShapeDtypeStruct((num_shards, 1, 1), jnp.float32),
        grid=(num_shards, tiles_per_shard),
        in_specs=[
            # Last dim == full C: legal block shape, no class padding, no extra
            # HBM traffic from a wrapper-side pad.
            pl.BlockSpec((tile_n, c), row_block),
            pl.BlockSpec((tile_n, 1), row_block),
        ],
        out_specs=pl.BlockSpec((1, 1, 1), lambda s, i: (s, 0, 0)),
        scratch_shapes=[pltpu.VMEM((tile_n, 1), jnp.float32)],
        compiler_params=pltpu.CompilerParams(
            dimension_semantics=("parallel", "arbitrary"),
            vmem_limit_bytes=vmem_limit,
        ),
    )(logits, t)

    # Scalar epilogue in plain JAX: mean CE over the true N, then focal modulation.
    logp = jnp.sum(partial_ce) / jnp.float32(n)
    p = jnp.exp(-logp)
    one_minus_p = 1.0 - p
    g = float(gamma)
    if g.is_integer() and 0.0 <= g <= 8.0:
        # gamma is a small integer (common case: 0 or 2): unroll the pow.
        mod = jnp.float32(1.0)
        for _ in range(int(g)):
            mod = mod * one_minus_p
    else:
        mod = one_minus_p ** jnp.float32(g)
    return jnp.float32(alpha) * mod * logp


def _reference(logits, target, gamma, alpha):
    lse = jax.nn.logsumexp(logits.astype(jnp.float32), axis=-1)
    ce = jnp.mean(lse - logits.astype(jnp.float32)[jnp.arange(logits.shape[0]), target])
    p = jnp.exp(-ce)
    return jnp.float32(alpha) * (1.0 - p) ** gamma * ce


if __name__ == "__main__":
    key = jax.random.PRNGKey(0)
    kx, kt, kx2, kt2 = jax.random.split(key, 4)

    # Case 1: small aligned-ish shapes (batch=8, classes=32), gamma=2, alpha=0.25.
    N, C = 8, 32
    logits = jax.random.normal(kx, (N, C), dtype=jnp.float32)
    target = jax.random.randint(kt, (N,), 0, C, dtype=jnp.int32)
    loss = focal_loss(logits, target, gamma=2.0, alpha=0.25)
    jax.block_until_ready(loss)
    ref = _reference(logits, target, 2.0, 0.25)
    assert jnp.allclose(loss, ref, rtol=1e-5, atol=1e-6), (loss, ref)

    # Case 2: ragged shapes (batch=13, classes=40) exercising row overhang and a
    # non-multiple-of-128 class dim, default gamma=0 / alpha=1 (pure CE path).
    N2, C2 = 13, 40
    logits2 = jax.random.normal(kx2, (N2, C2), dtype=jnp.float32)
    target2 = jax.random.randint(kt2, (N2,), 0, C2, dtype=jnp.int32)
    loss2 = focal_loss(logits2, target2, gamma=0.0, alpha=1.0)
    jax.block_until_ready(loss2)
    ref2 = _reference(logits2, target2, 0.0, 1.0)
    assert jnp.allclose(loss2, ref2, rtol=1e-5, atol=1e-6), (loss2, ref2)

    print("KERNEL_OK")
</pallas_src>

<mosaic_0001>
module attributes {stable_mosaic.version = 11 : i64} {
  func.func @_focal_ce_kernel(%arg0: i32, %arg1: i32, %arg2: memref<8x32xf32, #tpu.memory_space<vmem>>, %arg3: memref<8x1xi32, #tpu.memory_space<vmem>>, %arg4: memref<1x1x1xf32, #tpu.memory_space<vmem>>, %arg5: memref<8x1xf32, #tpu.memory_space<vmem>>) attributes {dimension_semantics = [#tpu.dimension_semantics<parallel>, #tpu.dimension_semantics<arbitrary>], iteration_bounds = array<i64: 1, 1>, scalar_prefetch = 0 : i64, scratch_operands = 1 : i64, tpu.core_type = #tpu.core_type<tc>, window_params = [{transform_indices = @transform_0, window_bounds = array<i64: 8, 32>}, {transform_indices = @transform_1, window_bounds = array<i64: 8, 1>}, {transform_indices = @transform_2, window_bounds = array<i64: 1, 1, 1>}]} {
    %c0_i32 = arith.constant 0 : i32
    %0 = arith.cmpi eq, %arg1, %c0_i32 : i32
    %1 = arith.extui %0 : i1 to i32
    %c0_i32_0 = arith.constant 0 : i32
    %2 = arith.cmpi ne, %1, %c0_i32_0 : i32
    scf.if %2 {
      %cst_15 = arith.constant 0.000000e+00 : f32
      %38 = vector.broadcast %cst_15 : f32 to vector<8x1xf32>
      %c0_16 = arith.constant 0 : index
      %c0_17 = arith.constant 0 : index
      %39 = vector.load %arg5[%c0_16, %c0_17] : memref<8x1xf32, #tpu.memory_space<vmem>>, vector<8x1xf32>
      tpu.vector_store %arg5[%c0_16, %c0_17], %38 {strides = array<i32>} : memref<8x1xf32, #tpu.memory_space<vmem>>, vector<8x1xf32>,
      %cst_18 = arith.constant 0.000000e+00 : f32
      %40 = vector.broadcast %cst_18 : f32 to vector<1x1x1xf32>
      %c0_19 = arith.constant 0 : index
      %c0_20 = arith.constant 0 : index
      %c0_21 = arith.constant 0 : index
      %41 = vector.load %arg4[%c0_19, %c0_20, %c0_21] : memref<1x1x1xf32, #tpu.memory_space<vmem>>, vector<1x1x1xf32>
      tpu.vector_store %arg4[%c0_19, %c0_20, %c0_21], %40 {strides = array<i32>} : memref<1x1x1xf32, #tpu.memory_space<vmem>>, vector<1x1x1xf32>,
    } else {
    }
    %c0 = arith.constant 0 : index
    %c0_1 = arith.constant 0 : index
    %3 = vector.load %arg2[%c0, %c0_1] : memref<8x32xf32, #tpu.memory_space<vmem>>, vector<8x32xf32>
    %c0_2 = arith.constant 0 : index
    %c0_3 = arith.constant 0 : index
    %4 = vector.load %arg3[%c0_2, %c0_3] : memref<8x1xi32, #tpu.memory_space<vmem>>, vector<8x1xi32>
    %cst = arith.constant dense<0xFF800000> : vector<8xf32>
    %5 = vector.multi_reduction <maximumf>, %3, %cst [1] : vector<8x32xf32> to vector<8xf32>
    %6 = vector.shape_cast %5 : vector<8xf32> to vector<8x1xf32>
    %7 = vector.broadcast %6 : vector<8x1xf32> to vector<8x32xf32>
    %8 = arith.subf %3, %7 : vector<8x32xf32>
    %9 = math.exp %8 : vector<8x32xf32>
    %cst_4 = arith.constant dense<0.000000e+00> : vector<8xf32>
    %10 = vector.multi_reduction <add>, %9, %cst_4 [1] : vector<8x32xf32> to vector<8xf32>
    %11 = vector.shape_cast %10 : vector<8xf32> to vector<8x1xf32>
    %12 = math.log %11 : vector<8x1xf32>
    %13 = arith.addf %12, %6 : vector<8x1xf32>
    %14 = tpu.iota {dimensions = array<i32: 1>} : vector<8x32xi32>
    %15 = vector.broadcast %4 : vector<8x1xi32> to vector<8x32xi32>
    %16 = arith.cmpi eq, %14, %15 : vector<8x32xi32>
    %cst_5 = arith.constant 0.000000e+00 : f32
    %17 = vector.broadcast %cst_5 : f32 to vector<8x32xf32>
    %18 = arith.select %16, %3, %17 : vector<8x32xi1>, vector<8x32xf32>
    %cst_6 = arith.constant dense<0.000000e+00> : vector<8xf32>
    %19 = vector.multi_reduction <add>, %18, %cst_6 [1] : vector<8x32xf32> to vector<8xf32>
    %20 = vector.shape_cast %19 : vector<8xf32> to vector<8x1xf32>
    %c1_i32 = arith.constant 1 : i32
    %21 = arith.muli %arg0, %c1_i32 : i32
    %22 = arith.addi %21, %arg1 : i32
    %c8_i32 = arith.constant 8 : i32
    %23 = arith.muli %22, %c8_i32 : i32
    %24 = tpu.iota {dimensions = array<i32: 0>} : vector<8x1xi32>
    %25 = vector.broadcast %23 : i32 to vector<8x1xi32>
    %26 = arith.addi %25, %24 : vector<8x1xi32>
    %c8_i32_7 = arith.constant 8 : i32
    %27 = vector.broadcast %c8_i32_7 : i32 to vector<8x1xi32>
    %28 = arith.cmpi slt, %26, %27 : vector<8x1xi32>
    %29 = arith.subf %13, %20 : vector<8x1xf32>
    %cst_8 = arith.constant 0.000000e+00 : f32
    %30 = vector.broadcast %cst_8 : f32 to vector<8x1xf32>
    %31 = arith.select %28, %29, %30 : vector<8x1xi1>, vector<8x1xf32>
    %c0_9 = arith.constant 0 : index
    %c0_10 = arith.constant 0 : index
    %32 = vector.load %arg5[%c0_9, %c0_10] : memref<8x1xf32, #tpu.memory_space<vmem>>, vector<8x1xf32>
    %33 = arith.addf %32, %31 : vector<8x1xf32>
    %c0_11 = arith.constant 0 : index
    %c0_12 = arith.constant 0 : index
    %34 = vector.load %arg5[%c0_11, %c0_12] : memref<8x1xf32, #tpu.memory_space<vmem>>, vector<8x1xf32>
    tpu.vector_store %arg5[%c0_11, %c0_12], %33 {strides = array<i32>} : memref<8x1xf32, #tpu.memory_space<vmem>>, vector<8x1xf32>,
    %c0_i32_13 = arith.constant 0 : i32
    %35 = arith.cmpi eq, %arg1, %c0_i32_13 : i32
    %36 = arith.extui %35 : i1 to i32
    %c0_i32_14 = arith.constant 0 : i32
    %37 = arith.cmpi ne, %36, %c0_i32_14 : i32
    scf.if %37 {
      %c0_15 = arith.constant 0 : index
      %c0_16 = arith.constant 0 : index
      %c0_17 = arith.constant 0 : index
      %38 = vector.load %arg4[%c0_15, %c0_16, %c0_17] : memref<1x1x1xf32, #tpu.memory_space<vmem>>, vector<1x1x1xf32>
      %c0_18 = arith.constant 0 : index
      %c0_19 = arith.constant 0 : index
      %39 = vector.load %arg5[%c0_18, %c0_19] : memref<8x1xf32, #tpu.memory_space<vmem>>, vector<8x1xf32>
      %40 = vector.shape_cast %39 : vector<8x1xf32> to vector<1x8x1xf32>
      %cst_20 = arith.constant dense<0.000000e+00> : vector<1xf32>
      %41 = vector.multi_reduction <add>, %40, %cst_20 [1, 2] : vector<1x8x1xf32> to vector<1xf32>
      %42 = vector.shape_cast %41 : vector<1xf32> to vector<1x1x1xf32>
      %43 = vector.extract %42[0, 0, 0] : f32 from vector<1x1x1xf32>
      %44 = vector.broadcast %43 : f32 to vector<1x1x1xf32>
      %45 = arith.addf %38, %44 : vector<1x1x1xf32>
      %c0_21 = arith.constant 0 : index
      %c0_22 = arith.constant 0 : index
      %c0_23 = arith.constant 0 : index
      %46 = vector.load %arg4[%c0_21, %c0_22, %c0_23] : memref<1x1x1xf32, #tpu.memory_space<vmem>>, vector<1x1x1xf32>
      tpu.vector_store %arg4[%c0_21, %c0_22, %c0_23], %45 {strides = array<i32>} : memref<1x1x1xf32, #tpu.memory_space<vmem>>, vector<1x1x1xf32>,
    } else {
    }
    return
  }
  func.func @transform_0(%arg0: i32, %arg1: i32) -> (i32, i32) {
    %c1_i32 = arith.constant 1 : i32
    %0 = arith.muli %arg0, %c1_i32 : i32
    %1 = arith.addi %0, %arg1 : i32
    %c0_i32 = arith.constant 0 : i32
    %2 = arith.minsi %1, %c0_i32 : i32
    %c0_i32_0 = arith.constant 0 : i32
    %c0_i32_1 = arith.constant 0 : i32
    return %2, %c0_i32_0 : i32, i32
  }
  func.func @transform_1(%arg0: i32, %arg1: i32) -> (i32, i32) {
    %c1_i32 = arith.constant 1 : i32
    %0 = arith.muli %arg0, %c1_i32 : i32
    %1 = arith.addi %0, %arg1 : i32
    %c0_i32 = arith.constant 0 : i32
    %2 = arith.minsi %1, %c0_i32 : i32
    %c0_i32_0 = arith.constant 0 : i32
    %c0_i32_1 = arith.constant 0 : i32
    return %2, %c0_i32_0 : i32, i32
  }
  func.func @transform_2(%arg0: i32, %arg1: i32) -> (i32, i32, i32) {
    %c0_i32 = arith.constant 0 : i32
    %c0_i32_0 = arith.constant 0 : i32
    %c0_i32_1 = arith.constant 0 : i32
    return %arg0, %c0_i32, %c0_i32_0 : i32, i32, i32
  }
}

</mosaic_0001>

<bundles_post_ra>
// kernel: tpu_custom_call.1
= control target key start
LH: loop header
LB: loop body
LE: loop exit
PB: predicated region body
PF: predicated region fallthrough
CT: control target
= control target key end

     0   :  { %vm76_vm0 = vcmask 261120   ;;  %s232_s0 = inlined_call_operand.vmem [shape: f32[8,32], index: 0, kind: input, shape index: {}]   ;;  %s233_s1 = inlined_call_operand.vmem [shape: s32[8,1], index: 1, kind: input, shape index: {}]   ;;  %s234_s2 = inlined_call_operand.hbm [shape: f32[1,1,1], index: 2, kind: output, shape index: {}]  }
   0x1   :  { %v74_v0 = vld [vmem:[%s232_s0] sm:$0xff] }
   0x2   :  { %7 = vsyncpa [#allocation4], 0  ;;  %v77_v1 = vsel %vm76_vm0, %v74_v0, -inf  ;;  %v191_v2 = vmov 0   ;;  %v75_v3 = vld [vmem:[%s233_s1] sm:$0xff]  ;;  %v89_v7 = vlaneseq  ;;  %vm70_vm2 = vcmask 7168  }
   0x3   :  { %162 = vset.pattern.permute.xlu0 %v191_v2  ;;  %v192_v14 = vmov 0.0   ;;  %vm72_vm3 = vcmask 0   ;;  %s193_s0 = smov [#allocation3]  }
   0x4   :  { %78 = vmax.xlane.f32.xlu0 %v77_v1  ;;  %v90_v8 = vand.u32 127, %v89_v7  ;;  %71 = vst.msk [vmem:[#allocation2] sm:$0xff] %vm70_vm2, %v192_v14  ;;  %s137_s1 = sshll.u32 %s193_s0, 4  ;;  %s138_s1 = int_to_ptr.vmem [resolvable:$true] %s137_s1 }
   0x5   :  { %73 = vst.msk [vmem:[#allocation3] sm:$0x1] %vm72_vm3, %v192_v14  ;;  %s167_s14 = scalar_lea.vmem %s138_s1, 16  ;;  %s171_s15 = scalar_lea.vmem %s138_s1, 32 }
   0x6   :  { %p168_p0 = scmp.ne.s32.totalorder %s138_s1, %s167_s14  ;;  %p172_p1 = scmp.lt.s32.totalorder %s138_s1, %s138_s1 }
   0x7   :  { %p173_p2 = scmp.lt.s32.totalorder %s171_s15, %s167_s14 }
   0x9   :  { %p174_p3 = por %p173_p2, %p172_p1 }
   0xb   :  { %v108_v20 = vld [vmem:[#allocation2] sm:$0xff]  ;;  %p175_p4 = pnand %p174_p3, %p168_p0 }
   0xc   :  { %v115_v32 = vld [vmem:[#allocation3] sm:$0x1] }
  0x1a   :  { %92 = vperm.xlu0 %162, %v75_v3  }
  0x91   :  { %v79_v4 = vpop.xlane.xlu0 %78 }
  0x92   :  { %v80_v5 = vsub.f32 %v74_v0, %v79_v4 }
  0x94   :  { %v81_v6 = vmul.f32 1.442695, %v80_v5 }
  0x96   :  { %163 = vpow2.f32 %v81_v6 }
  0x99   :  { %v93_v9 = vpop.permute.xlu0 %92 }
  0x9a   :  { %vm94_vm1 = vcmp.eq.s32.totalorder %v90_v8, %v93_v9 }
  0x9b   :  { %v95_v11 = vsel %vm94_vm1, %v74_v0, 0.0 }
  0x9c   :  { %v96_v13 = vsel %vm76_vm0, %v95_v11, 0.0 }
  0xa0   :  { %v164_v10 = vpop.eup %163 }
  0xa1   :  { %v83_v12 = vsel %vm76_vm0, %v164_v10, 0.0 }
  0xa2   :  { %84 = vadd.xlane.f32.xlu1 %v83_v12 }
  0xa6   :  { %97 = vadd.xlane.f32.xlu1 %v96_v13 }
 0x12f   :  { %v85_v15 = vpop.xlane.xlu1 %84 }
 0x130   :  { %165 = vlog2.f32 %v85_v15 }
 0x133   :  { %v98_v18 = vpop.xlane.xlu1 %97 }
 0x13a   :  { %v166_v16 = vpop.eup %165 }
 0x13b   :  { %v87_v17 = vmul.f32 0.6931472, %v166_v16 }
 0x13d   :  { %v88_v19 = vadd.f32 %v87_v17, %v79_v4 }
 0x13f   :  { %v106_v21 = vsub.f32 %v88_v19, %v98_v18 }
 0x141   :  { %v109_v22 = vadd.f32 %v108_v20, %v106_v21 }
 0x143   :  { %111 = vst.msk [vmem:[#allocation2] sm:$0xff] %vm70_vm2, %v109_v22 }
 0x14a   :  { %v116_v23 = vld [vmem:[#allocation2] sm:$0xff] }
 0x14b   :  { %v117_v24 = vsel %vm70_vm2, %v116_v23, 0.0 }
 0x14c   :  { %118 = vadd.xlane.f32.xlu1 %v117_v24 }
 0x1d9   :  { %v119_v25 = vpop.xlane.xlu1 %118 }
 0x1da   :  { %v120_v26 = vrot.slane %v119_v25, 4 }
 0x1dc   :  { %v121_v27 = vadd.f32 %v120_v26, %v119_v25 }
 0x1de   :  { %v122_v28 = vrot.slane %v121_v27, 2 }
 0x1e0   :  { %v123_v29 = vadd.f32 %v122_v28, %v121_v27 }
 0x1e2   :  { %v124_v30 = vrot.slane %v123_v29, 1 }
 0x1e4   :  { %v125_v31 = vadd.f32 %v124_v30, %v123_v29 }
 0x1e6   :  { %157 = vpush %v125_v31 }
 0x217   :  { %s158_s13 = spop %157 }
 0x218   :  { %v127_v33 = vstv %s158_s13 }
 0x219   :  { %v128_v34 = vadd.f32 %v127_v33, %v115_v32 }
 0x21b   :  { %130 = vst.msk [vmem:[#allocation3] sm:$0x1] %vm72_vm3, %v128_v34 }
 0x21c   :  { %178 = shalt.err (!%p175_p4)
}
 0x21d   :  { %s179_s18 = scalar_lea.hbm %s234_s2, 16 }
 0x21e   :  { %p180_p5 = scmp.ne.s32.totalorder %s234_s2, %s179_s18  ;;  %p183_p6 = scmp.lt.u32.totalorder %s179_s18, %s234_s2 }
 0x220   :  { %p185_p7 = pnand %p183_p6, %p180_p5 }
 0x222   :  { %188 = shalt.err (!%p185_p7)
}
 0x223   :  { %140 = dma.vmem_to_hbm [thread:$0]  %s138_s1, 16, %s234_s2, [#allocation4]  }
 0x224   :  { %189 = dma.done.wait [#allocation4], 16  }
 0x225   :  { %190 = vsyncadd [#allocation4], 4294967280 }
 0x226   :  { %144 = vsyncpa [#allocation4], 1 }

</bundles_post_ra>
